<compile_context>
chip_gen: v7x
topology: tpu7x:2x2x1
jax: 0.10.0
libtpu: 0.0.40
codegen_flags: <defaults>
</compile_context>

<pallas_src>
import functools

import jax
import jax.numpy as jnp
import numpy as np
from jax.experimental import pallas as pl
from jax.experimental.pallas import tpu as pltpu


def _gcn_kernel(alpha_ref, seq_ref, adj_ref, w_ref, bias_ref, out_ref, *,
                agg_first, compute_dtype):
    # alpha_ref: (1,)            SMEM (scalar prefetch) — PReLU slope
    # seq_ref:   (Bt, N, F_in)   VMEM, compute_dtype
    # adj_ref:   (Bt, N, N)      VMEM, compute_dtype
    # w_ref:     (F_in, F_out)   VMEM, compute_dtype
    # bias_ref:  (1, F_out)      VMEM, f32
    # out_ref:   (Bt, N, F_out)  VMEM, f32
    bt, n, f_in = seq_ref.shape
    f_out = w_ref.shape[1]
    bn = bt * n

    alpha = alpha_ref[0]

    if agg_first:
        # --- Aggregate first (F_out > F_in): N^2 matmul stays F_in-wide -----
        agg = jnp.einsum("bnm,bmf->bnf", adj_ref[...], seq_ref[...],
                         preferred_element_type=jnp.float32)      # (Bt,N,F_in)
        agg = agg.astype(compute_dtype).reshape(bn, f_in)
        out = jnp.dot(agg, w_ref[...],
                      preferred_element_type=jnp.float32)         # (Bt*N,F_out)
        out = out.reshape(bt, n, f_out)
    else:
        # --- Linear first (F_out <= F_in), hoisted across the batch tile ----
        seq_flat = seq_ref[...].reshape(bn, f_in)
        fts = jnp.dot(seq_flat, w_ref[...],
                      preferred_element_type=jnp.float32)         # (Bt*N,F_out)
        fts = fts.astype(compute_dtype).reshape(bt, n, f_out)
        out = jnp.einsum("bnm,bmf->bnf", adj_ref[...], fts,
                         preferred_element_type=jnp.float32)      # (Bt,N,F_out)

    # --- Bias + PReLU epilogue in f32 ----------------------------------------
    out = out + bias_ref[...]
    out = jnp.where(out >= 0, out, alpha * out)
    out_ref[...] = out.astype(out_ref.dtype)


def gcn_forward(seq, adj, weight, bias, prelu_alpha, *,
                batch_tile=None, compute_dtype=jnp.bfloat16):
    """seq: (B, N, F_in), adj: (B, N, N), weight: (F_in, F_out),
    bias: (F_out,), prelu_alpha: python float."""
    B, N, F_in = seq.shape
    F_out = weight.shape[1]
    assert adj.shape == (B, N, N)
    # Layout-free collapse of (Bt, N) into the matmul M dimension.
    assert N % 8 == 0, "N must be a multiple of 8 for the hoisted matmul reshape"

    agg_first = F_out > F_in

    seq_c = seq.astype(compute_dtype)
    adj_c = adj.astype(compute_dtype)
    w_c = weight.astype(compute_dtype)
    bias2d = bias.reshape(1, F_out).astype(jnp.float32)
    alpha = jnp.asarray([prelu_alpha], dtype=jnp.float32)   # -> SMEM

    cb = jnp.dtype(compute_dtype).itemsize
    # Double-buffered per-batch-element tile bytes (seq + adj + f32 out).
    per_b = 2 * (N * F_in * cb + N * N * cb + N * F_out * 4)
    vmem_tile_budget = 20 * 1024 * 1024
    max_bt_vmem = max(1, vmem_tile_budget // per_b)

    if batch_tile is None:
        divisors = [d for d in range(1, B + 1) if B % d == 0]
        cands = [d for d in divisors if d <= max_bt_vmem]
        if B >= 2:
            # Keep grid >= 2 so v7x's two TensorCores both get work.
            two_core = [d for d in cands if B // d >= 2]
            if two_core:
                cands = two_core
        # Prefer the smallest Bt that gives >= 512 matmul rows; else the
        # largest feasible tile (amortizes per-grid-step overhead).
        big_m = [d for d in cands if d * N >= 512]
        batch_tile = min(big_m) if big_m else max(cands)
    Bt = batch_tile
    assert B % Bt == 0
    grid = (B // Bt,)

    inner = F_in if agg_first else F_out
    flops = 2 * B * N * (N * inner + F_in * F_out)
    bytes_accessed = (B * N * F_in * cb + B * N * N * cb + F_in * F_out * cb
                      + F_out * 4 + B * N * F_out * 4)

    kernel = functools.partial(_gcn_kernel, agg_first=agg_first,
                               compute_dtype=compute_dtype)

    return pl.pallas_call(
        kernel,
        out_shape=jax.ShapeDtypeStruct((B, N, F_out), jnp.float32),
        grid_spec=pltpu.PrefetchScalarGridSpec(
            num_scalar_prefetch=1,          # alpha -> SMEM
            grid=grid,
            in_specs=[
                pl.BlockSpec((Bt, N, F_in), lambda b, *_: (b, 0, 0)),
                pl.BlockSpec((Bt, N, N), lambda b, *_: (b, 0, 0)),
                pl.BlockSpec((F_in, F_out), lambda b, *_: (0, 0)),
                pl.BlockSpec((1, F_out), lambda b, *_: (0, 0)),
            ],
            out_specs=pl.BlockSpec((Bt, N, F_out), lambda b, *_: (b, 0, 0)),
        ),
        compiler_params=pltpu.CompilerParams(
            dimension_semantics=("parallel",),
            vmem_limit_bytes=48 * 1024 * 1024),
        cost_estimate=pl.CostEstimate(
            flops=flops, transcendentals=0, bytes_accessed=bytes_accessed),
    )(alpha, seq_c, adj_c, w_c, bias2d)


def xavier_uniform(key, fan_out, fan_in):
    # Matches torch.nn.init.xavier_uniform_ on a (fan_out, fan_in) weight.
    limit = float(np.sqrt(6.0 / (fan_in + fan_out)))
    return jax.random.uniform(key, (fan_out, fan_in),
                              minval=-limit, maxval=limit, dtype=jnp.float32)


def ref_gcn(seq, adj, weight, bias, alpha, compute_dtype):
    """Plain-JAX reference with the same dtype/contraction discipline."""
    F_in, F_out = weight.shape
    s = seq.astype(compute_dtype)
    a = adj.astype(compute_dtype)
    w = weight.astype(compute_dtype)
    if F_out > F_in:
        agg = jnp.einsum("bnm,bmf->bnf", a, s,
                         preferred_element_type=jnp.float32).astype(compute_dtype)
        out = jnp.einsum("bnf,fo->bno", agg, w,
                         preferred_element_type=jnp.float32)
    else:
        fts = jnp.einsum("bnf,fo->bno", s, w,
                         preferred_element_type=jnp.float32).astype(compute_dtype)
        out = jnp.einsum("bnm,bmf->bnf", a, fts,
                         preferred_element_type=jnp.float32)
    out = out + bias.astype(jnp.float32)
    return jnp.where(out >= 0, out, alpha * out)


def ref_gcn_f32(seq, adj, weight, bias, alpha):
    out = jnp.einsum("bnm,bmf->bnf", adj, seq @ weight) + bias
    return jnp.where(out >= 0, out, alpha * out)


if __name__ == "__main__":
    B, N, in_ft = 4, 16, 32

    key = jax.random.PRNGKey(0)
    k_seq, k_adj, k_w1, k_w2 = jax.random.split(key, 4)

    seq = jax.random.normal(k_seq, (B, N, in_ft), dtype=jnp.float32)
    adj_raw = jax.random.uniform(k_adj, (B, N, N), dtype=jnp.float32)
    adj = 0.5 * (adj_raw + jnp.swapaxes(adj_raw, -1, -2))
    prelu_alpha = 0.25                                 # nn.PReLU() default

    # Two configs exercise both contraction orders and both grid layouts:
    #   (out_ft=64 > in_ft)  -> aggregate-first path, auto Bt=2, grid=(2,)
    #   (out_ft=16 <= in_ft) -> linear-first path,    Bt=1,      grid=(4,)
    for out_ft, kw, bt in ((64, k_w1, None), (16, k_w2, 1)):
        w_torch = xavier_uniform(kw, out_ft, in_ft)    # torch Linear (out, in)
        weight = w_torch.T                             # kernel expects (in, out)
        bias = jnp.zeros((out_ft,), dtype=jnp.float32) # bias.data.fill_(0.0)

        out = jax.block_until_ready(
            gcn_forward(seq, adj, weight, bias, prelu_alpha, batch_tile=bt))

        ref = ref_gcn(seq, adj, weight, bias, prelu_alpha, jnp.bfloat16)
        np.testing.assert_allclose(np.asarray(out), np.asarray(ref),
                                   rtol=1e-4, atol=1e-4)
        # Loose semantic sanity check against the exact f32 torch math.
        ref32 = ref_gcn_f32(seq, adj, weight, bias, prelu_alpha)
        np.testing.assert_allclose(np.asarray(out), np.asarray(ref32),
                                   rtol=0.0, atol=0.2)

    # Exact-f32 path (compute_dtype=float32) matches the f32 reference tightly.
    w_torch = xavier_uniform(k_w1, 32, in_ft)
    weight = w_torch.T
    bias = jnp.zeros((32,), dtype=jnp.float32)
    out32 = jax.block_until_ready(
        gcn_forward(seq, adj, weight, bias, prelu_alpha,
                    compute_dtype=jnp.float32))
    ref32 = ref_gcn_f32(seq, adj, weight, bias, prelu_alpha)
    np.testing.assert_allclose(np.asarray(out32), np.asarray(ref32),
                               rtol=1e-5, atol=1e-5)

    print("KERNEL_OK")
</pallas_src>

<mosaic_0001>
module attributes {stable_mosaic.version = 11 : i64} {
  func.func @_gcn_kernel(%arg0: i32, %arg1: memref<1xf32, #tpu.memory_space<smem>>, %arg2: memref<2x16x32xbf16, #tpu.memory_space<vmem>>, %arg3: memref<2x16x16xbf16, #tpu.memory_space<vmem>>, %arg4: memref<32x64xbf16, #tpu.memory_space<vmem>>, %arg5: memref<1x64xf32, #tpu.memory_space<vmem>>, %arg6: memref<2x16x64xf32, #tpu.memory_space<vmem>>) attributes {dimension_semantics = [#tpu.dimension_semantics<parallel>], iteration_bounds = array<i64: 2>, scalar_prefetch = 1 : i64, scratch_operands = 0 : i64, tpu.core_type = #tpu.core_type<tc>, window_params = [{transform_indices = @transform_0, window_bounds = array<i64: 2, 16, 32>}, {transform_indices = @transform_1, window_bounds = array<i64: 2, 16, 16>}, {pipeline_mode = #tpu.pipeline_mode<synchronous>, transform_indices = @transform_2, window_bounds = array<i64: 32, 64>}, {pipeline_mode = #tpu.pipeline_mode<synchronous>, transform_indices = @transform_3, window_bounds = array<i64: 1, 64>}, {transform_indices = @transform_4, window_bounds = array<i64: 2, 16, 64>}]} {
    %c0 = arith.constant 0 : index
    %0 = memref.load %arg1[%c0] : memref<1xf32, #tpu.memory_space<smem>>
    %c0_0 = arith.constant 0 : index
    %c0_1 = arith.constant 0 : index
    %c0_2 = arith.constant 0 : index
    %1 = vector.load %arg3[%c0_0, %c0_1, %c0_2] : memref<2x16x16xbf16, #tpu.memory_space<vmem>>, vector<2x16x16xbf16>
    %c0_3 = arith.constant 0 : index
    %c0_4 = arith.constant 0 : index
    %c0_5 = arith.constant 0 : index
    %2 = vector.load %arg2[%c0_3, %c0_4, %c0_5] : memref<2x16x32xbf16, #tpu.memory_space<vmem>>, vector<2x16x32xbf16>
    "tpu.trace_start"() <{level = 10 : i32, message = "bnm,bmf->bnf"}> : () -> ()
    %cst = arith.constant dense<0.000000e+00> : vector<2x16x32xf32>
    %3 = tpu.matmul %1, %2, %cst {dimension_numbers = #tpu.dot_dimension_numbers<[2], [1], [1], [2], [0, 0, 0, 1, 1, 2], [0], [0]>} : vector<2x16x16xbf16>, vector<2x16x32xbf16>, vector<2x16x32xf32> -> vector<2x16x32xf32>
    "tpu.trace_stop"() : () -> ()
    %4 = arith.truncf %3 : vector<2x16x32xf32> to vector<2x16x32xbf16>
    %5 = vector.shape_cast %4 : vector<2x16x32xbf16> to vector<32x32xbf16>
    %c0_6 = arith.constant 0 : index
    %c0_7 = arith.constant 0 : index
    %6 = vector.load %arg4[%c0_6, %c0_7] : memref<32x64xbf16, #tpu.memory_space<vmem>>, vector<32x64xbf16>
    %cst_8 = arith.constant dense<0.000000e+00> : vector<32x64xf32>
    %7 = tpu.matmul %5, %6, %cst_8 {dimension_numbers = #tpu.dot_dimension_numbers<[1], [0], [0], [1], [0, 0, 1, 1], [], []>} : vector<32x32xbf16>, vector<32x64xbf16>, vector<32x64xf32> -> vector<32x64xf32>
    %8 = vector.shape_cast %7 : vector<32x64xf32> to vector<2x16x64xf32>
    %c0_9 = arith.constant 0 : index
    %c0_10 = arith.constant 0 : index
    %9 = vector.load %arg5[%c0_9, %c0_10] : memref<1x64xf32, #tpu.memory_space<vmem>>, vector<1x64xf32>
    %10 = vector.shape_cast %9 : vector<1x64xf32> to vector<1x1x64xf32>
    %11 = vector.broadcast %10 : vector<1x1x64xf32> to vector<2x16x64xf32>
    %12 = arith.addf %8, %11 : vector<2x16x64xf32>
    %cst_11 = arith.constant 0.000000e+00 : f32
    %13 = vector.broadcast %cst_11 : f32 to vector<2x16x64xf32>
    %14 = arith.cmpf oge, %12, %13 : vector<2x16x64xf32>
    %15 = vector.broadcast %0 : f32 to vector<2x16x64xf32>
    %16 = arith.mulf %15, %12 : vector<2x16x64xf32>
    %17 = arith.select %14, %12, %16 : vector<2x16x64xi1>, vector<2x16x64xf32>
    %c0_12 = arith.constant 0 : index
    %c0_13 = arith.constant 0 : index
    %c0_14 = arith.constant 0 : index
    %18 = vector.load %arg6[%c0_12, %c0_13, %c0_14] : memref<2x16x64xf32, #tpu.memory_space<vmem>>, vector<2x16x64xf32>
    tpu.vector_store %arg6[%c0_12, %c0_13, %c0_14], %17 {strides = array<i32>} : memref<2x16x64xf32, #tpu.memory_space<vmem>>, vector<2x16x64xf32>,
    return
  }
  func.func @transform_0(%arg0: i32, %arg1: memref<1xf32, #tpu.memory_space<smem>>) -> (i32, i32, i32) {
    %c0_i32 = arith.constant 0 : i32
    %c0_i32_0 = arith.constant 0 : i32
    %c0_i32_1 = arith.constant 0 : i32
    return %arg0, %c0_i32, %c0_i32_0 : i32, i32, i32
  }
  func.func @transform_1(%arg0: i32, %arg1: memref<1xf32, #tpu.memory_space<smem>>) -> (i32, i32, i32) {
    %c0_i32 = arith.constant 0 : i32
    %c0_i32_0 = arith.constant 0 : i32
    %c0_i32_1 = arith.constant 0 : i32
    return %arg0, %c0_i32, %c0_i32_0 : i32, i32, i32
  }
  func.func @transform_2(%arg0: i32, %arg1: memref<1xf32, #tpu.memory_space<smem>>) -> (i32, i32) {
    %c0_i32 = arith.constant 0 : i32
    %c0_i32_0 = arith.constant 0 : i32
    %c0_i32_1 = arith.constant 0 : i32
    return %c0_i32, %c0_i32_0 : i32, i32
  }
  func.func @transform_3(%arg0: i32, %arg1: memref<1xf32, #tpu.memory_space<smem>>) -> (i32, i32) {
    %c0_i32 = arith.constant 0 : i32
    %c0_i32_0 = arith.constant 0 : i32
    %c0_i32_1 = arith.constant 0 : i32
    return %c0_i32, %c0_i32_0 : i32, i32
  }
  func.func @transform_4(%arg0: i32, %arg1: memref<1xf32, #tpu.memory_space<smem>>) -> (i32, i32, i32) {
    %c0_i32 = arith.constant 0 : i32
    %c0_i32_0 = arith.constant 0 : i32
    %c0_i32_1 = arith.constant 0 : i32
    return %arg0, %c0_i32, %c0_i32_0 : i32, i32, i32
  }
}

</mosaic_0001>

<bundles_post_ra>
// kernel: tpu_custom_call.1
= control target key start
LH: loop header
LB: loop body
LE: loop exit
PB: predicated region body
PF: predicated region fallthrough
CT: control target
= control target key end

     0   :  { %s1231_s0 = inlined_call_operand.<no memory space> [shape: f32[1], index: 0, kind: input, shape index: {}]   ;;  %s1232_s1 = inlined_call_operand.hbm [shape: bf16[4,16,32], index: 1, kind: input, shape index: {}]   ;;  %s1233_s2 = inlined_call_operand.hbm [shape: bf16[4,16,16], index: 2, kind: input, shape index: {}]   ;;  %s1234_s3 = inlined_call_operand.hbm [shape: bf16[32,64], index: 3, kind: input, shape index: {}]   ;;  %s1235_s4 = inlined_call_operand.vmem [shape: f32[1,64], index: 4, kind: input, shape index: {}]   ;;  %s1236_s5 = inlined_call_operand.hbm [shape: f32[4,16,64], index: 5, kind: output, shape index: {}]  }
   0x1   :  { %1244 = sst [smem:[#allocation16_spill]] %s1232_s1 }
   0x2   :  { %1245 = sst [smem:[#allocation17_spill]] %s1234_s3 }
   0x3   :  { %10 = sst [smem:[#allocation3]] %s1231_s0 }
   0x4   :  { %11 = vsyncpa [#allocation5], 0 }
   0x5   :  { %13 = vsyncpa [#allocation5 + $0x1], 0 }
   0x6   :  { %14 = vsyncpa [#allocation8], 0 }
   0x7   :  { %16 = vsyncpa [#allocation8 + $0x1], 0 }
   0x8   :  { %17 = vsyncpa [#allocation6], 0 }
   0x9   :  { %19 = vsyncpa [#allocation6 + $0x1], 0  ;;  %s970_s20 = smov 0   ;;  %s972_s21 = smov 0  }
   0xa   :  { %s974_s22 = smov 0   ;;  %s976_s23 = smov 0  }
   0xb LB: > { %s991_s0 = sadd.s32 4294967295, %s925_s23   ;;  %s621_s24 = sadd.s32 4294967294, %s925_s23   ;;  %s925_s23 = sphi %s976_s23, %s1268_s23   ;;  %s921_s22 = sphi %s974_s22, %s1267_s22   ;;  %s917_s21 = sphi %s972_s21, %s1266_s21   ;;  %s913_s20 = sphi %s970_s20, %s1265_s20  }
   0xc   : > { %p45_p0 = scmp.ne.s32.totalorder %s917_s21, %s913_s20  ;;  %p1237_p1 = scmp.eq.s32.totalorder %s991_s0, 0 }
   0xd   : > { %p143_p3 = scmp.eq.s32.totalorder %s621_s24, 1  ;;  %p622_p5 = scmp.ge.s32.totalorder %s925_s23, 1 }
   0xe   : > { %p1000_p4 = por %p1237_p1, %p45_p0  ;;  %p150_p7 = scmp.lt.s32.totalorder %s925_s23, 3 }
   0xf   : > { %p1005_p6 = por %p143_p3, %p45_p0  ;;  %s927_s28 = smov [#allocation9]  }
  0x10   : > { %s1246_s25 = scalar_select %p1000_p4, 1, 0 }
  0x11   : > { %s1247_s26 = scalar_select %p1005_p6, 1, 0 }
  0x12   : > { %p1010_p8 = pnand %p622_p5, %p150_p7  ;;  %s162_s29 = sshll.u32 %s927_s28, 4  ;;  %s1014_s29 = int_to_ptr.vmem [resolvable:$true] %s162_s29 }
  0x13   : > { %s1026_s6 = sadd.s32 1, %s925_s23   ;;  %s32_s7 = sadd.s32 1, %s921_s22 }
  0x14   : > { %s1248_s27 = scalar_select %p1010_p8, 1, 0 }
  0x15   : > { %p699_p9 = pneg %p1010_p8  ;;  %s29_s8 = ssub.s32 %s925_s23, %s1026_s6 }
  0x16   : > { %s1250_s3 = sld [smem:[#allocation17_spill]] }
  0x17   : > { %p1021_p11 = pnand %p699_p9, %p1237_p1 }
  0x19   : > { %p765_p13 = pneg %p1021_p11 }
  0x1c   : > { %s763_s11 = scalar_lea.hbm %s1250_s3, 256 }
  0x1d   : > { %p764_p12 = scmp.ne.s32.totalorder %s1250_s3, %s763_s11  ;;  %p770_p5 = scmp.lt.u32.totalorder %s763_s11, %s1250_s3 }
  0x1f   : > { %p766_p0 = pnand %p765_p13, %p764_p12 }
  0x21   : > { %p767_p3 = pneg %p766_p0 }
  0x23   : > { %p772_p7 = pnand %p770_p5, %p767_p3 }
  0x25   : > { %775 = shalt.err (!%p772_p7)
}
  0x26   : > { %s776_s16 = scalar_lea.vmem %s1014_s29, 256  ;;  %p784_p2 = scmp.lt.s32.totalorder %s1014_s29, %s1014_s29 }
  0x27   : > { %p777_p9 = scmp.ne.s32.totalorder %s1014_s29, %s776_s16  ;;  %p785_p6 = scmp.lt.s32.totalorder %s776_s16, %s776_s16 }
  0x29   : > { %p779_p10 = pnand %p777_p9, %p765_p13  ;;  %p786_p4 = por %p785_p6, %p784_p2 }
  0x2b   : > { %p780_p1 = pneg %p779_p10 }
  0x2d   : > { %p787_p8 = pnand %p786_p4, %p780_p1 }
  0x2f   : > { %790 = shalt.err (!%p787_p8)
}
  0x30   : > { %s1240_s17 = smov 64   ;;  %s1242_s18 = smov 4  }
  0x31   : > { %702 = dma.hbm_to_vmem [thread:$0]  (!%p1021_p11), %s1250_s3, 256, %s1014_s29, [#allocation8], %s1240_s17, %s1240_s17, %s1242_s18  }
  0x32   : > { %p30_p1 = scmp.eq.s32.totalorder %s29_s8, 0  ;;  %p39_p2 = scmp.ne.s32.totalorder %s921_s22, %s917_s21 }
  0x33   : > { %p40_p4 = scmp.eq.s32.totalorder %s925_s23, 0  ;;  %p715_p6 = scmp.lt.s32.totalorder %s925_s23, 2 }
  0x34   : > { %s1060_s28 = scalar_select %p30_p1, %s921_s22, %s32_s7  }
  0x35   : > { %p41_p8 = por %p40_p4, %p39_p2  ;;  %p1252_p10 = scmp.eq.s32.totalorder %s991_s0, 1 }
  0x36   : > { %1251 = sst [smem:[#allocation15_spill]] %s1060_s28  ;;  %s179_s30 = sand.u32 1, %s921_s22  }
  0x37   : > { %p1064_p12 = por %p1252_p10, %p39_p2  ;;  %s656_s10 = sshll.u32 %s925_s23, 8 }
  0x38   : > { %s1070_s11 = sshll.u32 %s179_s30, 4  ;;  %s1254_s1 = sld [smem:[#allocation16_spill]] }
  0x39   : > { %s183_s7 = scalar_lea.vmem [#allocation4], %s1070_s11  ;;  %p1078_p11 = pnand %p715_p6, %p41_p8 }
  0x3a   : > { %s191_s8 = sshll.u32 %s183_s7, 4  ;;  %s1087_s19 = scalar_lea.hbm %s1233_s2, %s656_s10  ;;  %s1082_s8 = int_to_ptr.vmem [resolvable:$true] %s191_s8 }
  0x3b   : > { %s1089_s24 = scalar_lea.sflag [#allocation5], %s179_s30  ;;  %p793_p0 = pneg %p1078_p11 }
  0x3e   : > { %s1075_s29 = scalar_lea.hbm %s1254_s1, %s656_s10  ;;  %s796_s17 = scalar_lea.hbm %s1254_s1, 512 }
  0x3f   : > { %s791_s12 = scalar_lea.hbm %s1075_s29, 256  ;;  %p797_p7 = scmp.lt.u32.totalorder %s1075_s29, %s1254_s1 }
  0x40   : > { %p792_p13 = scmp.ne.s32.totalorder %s1075_s29, %s791_s12  ;;  %p798_p9 = scmp.lt.u32.totalorder %s796_s17, %s791_s12 }
  0x41   : > { %p800_p2 = scmp.lt.u32.totalorder %s791_s12, %s1075_s29 }
  0x42   : > { %p794_p3 = pnand %p793_p0, %p792_p13  ;;  %p799_p1 = por %p798_p9, %p797_p7 }
  0x44   : > { %p795_p5 = pneg %p794_p3  ;;  %p801_p4 = por %p800_p2, %p799_p1 }
  0x46   : > { %p802_p6 = pnand %p801_p4, %p795_p5 }
  0x48   : > { %805 = shalt.err (!%p802_p6)
}
  0x49   : > { %s806_s30 = scalar_lea.vmem %s1082_s8, 256  ;;  %s930_s10 = smov [#allocation4]  }
  0x4a   : > { %p807_p8 = scmp.ne.s32.totalorder %s1082_s8, %s806_s30  ;;  %s811_s15 = sshll.u32 %s930_s10, 4  ;;  %s812_s15 = int_to_ptr.vmem [resolvable:$false] %s811_s15 }
  0x4b   : > { %s813_s3 = scalar_lea.vmem %s812_s15, 512  ;;  %p814_p3 = scmp.lt.s32.totalorder %s1082_s8, %s812_s15 }
  0x4c   : > { %p809_p10 = pnand %p807_p8, %p793_p0  ;;  %p815_p7 = scmp.lt.s32.totalorder %s813_s3, %s806_s30 }
  0x4e   : > { %p810_p13 = pneg %p809_p10  ;;  %p816_p9 = por %p815_p7, %p814_p3 }
  0x50   : > { %p817_p1 = pnand %p816_p9, %p810_p13 }
  0x52   : > { %820 = shalt.err (!%p817_p1)
}
  0x53   : > { %s1256_s17 = smov 4   ;;  %s1257_s18 = smov 64  }
  0x54   : > { %706 = dma.hbm_to_vmem [thread:$0]  (!%p1078_p11), %s1075_s29, 256, %s1082_s8, %s1089_s24, %s1257_s18, %s1257_s18, %s1256_s17  }
  0x55   : > { %s205_s16 = scalar_lea.vmem [#allocation7], %s1070_s11  ;;  %s201_s13 = sand.u32 1, %s925_s23  }
  0x56   : > { %s213_s12 = sshll.u32 %s205_s16, 4  ;;  %s1124_s7 = scalar_lea.sflag [#allocation8], %s201_s13  ;;  %s1122_s12 = int_to_ptr.vmem [resolvable:$true] %s213_s12 }
  0x57   : > { %s821_s30 = scalar_lea.hbm %s1087_s19, 256  ;;  %s826_s3 = scalar_lea.hbm %s1233_s2, 512 }
  0x58   : > { %p822_p5 = scmp.ne.s32.totalorder %s1087_s19, %s821_s30  ;;  %p827_p6 = scmp.lt.u32.totalorder %s1087_s19, %s1233_s2 }
  0x59   : > { %p828_p8 = scmp.lt.u32.totalorder %s826_s3, %s821_s30  ;;  %p830_p13 = scmp.lt.u32.totalorder %s821_s30, %s1087_s19 }
  0x5a   : > { %p824_p2 = pnand %p822_p5, %p793_p0 }
  0x5b   : > { %p829_p10 = por %p828_p8, %p827_p6 }
  0x5c   : > { %p825_p4 = pneg %p824_p2 }
  0x5d   : > { %p831_p3 = por %p830_p13, %p829_p10 }
  0x5f   : > { %p832_p7 = pnand %p831_p3, %p825_p4 }
  0x61   : > { %835 = shalt.err (!%p832_p7)
}
  0x62   : > { %s836_s11 = scalar_lea.vmem %s1122_s12, 256  ;;  %s931_s29 = smov [#allocation7]  }
  0x63   : > { %p837_p9 = scmp.ne.s32.totalorder %s1122_s12, %s836_s11  ;;  %s841_s8 = sshll.u32 %s931_s29, 4  ;;  %s842_s8 = int_to_ptr.vmem [resolvable:$false] %s841_s8 }
  0x64   : > { %s843_s1 = scalar_lea.vmem %s842_s8, 512  ;;  %p844_p2 = scmp.lt.s32.totalorder %s1122_s12, %s842_s8 }
  0x65   : > { %p839_p1 = pnand %p837_p9, %p793_p0  ;;  %p845_p6 = scmp.lt.s32.totalorder %s843_s1, %s836_s11 }
  0x67   : > { %p840_p5 = pneg %p839_p1  ;;  %p846_p8 = por %p845_p6, %p844_p2 }
  0x69   : > { %p847_p10 = pnand %p846_p8, %p840_p5 }
  0x6b   : > { %850 = shalt.err (!%p847_p10)
}
  0x6c   : > { %709 = dma.hbm_to_vmem [thread:$0]  (!%p1078_p11), %s1087_s19, 256, %s1122_s12, %s1124_s7, %s1257_s18, %s1257_s18, %s1256_s17  }
  0x6d   : > { %p1258_p0 = scmp.ne.s32.totalorder %s1248_s27, 0 }
  0x6e   : > { %s1156_s28 = sand.u32 (!%p1258_p0), 1, %s917_s21   ;;  %p1259_p4 = scmp.ne.s32.totalorder (!%p1258_p0), %s1246_s25, 0 }
  0x6f   : > { %225 = sbr.rel (%p1258_p0) target bundleno = 583 (0x247), region = 36  ;;  %s634_s24 = sshll.u32 (!%p1258_p0), %s1156_s28, 4 }
  0x70   : > { %s228_s16 = scalar_lea.sflag (!%p1258_p0), [#allocation5], %s1156_s28  ;;  %s231_s13 = scalar_lea.vmem (!%p1258_p0), [#allocation4], %s634_s24 }
  0x76   : > { %896 = dma.done.wait (%p1259_p4), %s228_s16, 256  }
  0x77   : > { %898 = vsyncadd (%p1259_p4), %s228_s16, 4294967040  ;;  %s236_s14 = sand.u32 1, %s991_s0   ;;  %s240_s27 = scalar_lea.vmem [#allocation7], %s634_s24 }
  0x78   : > { %s237_s19 = scalar_lea.sflag [#allocation8], %s236_s14 }
  0x79   : > { %900 = dma.done.wait (%p1259_p4), %s237_s19, 256  }
  0x7a   : > { %902 = vsyncadd (%p1259_p4), %s237_s19, 4294967040  ;;  %p1260_p11 = scmp.eq.s32.totalorder %s991_s0, 0 }
  0x7c   : > { %904 = dma.done.wait (%p1260_p11), [#allocation8], 256   ;;  %p1261_p13 = pmov %p1260_p11 }
  0x7d   : > { %v932_v0 = vmov 0.0   ;;  %vm933_vm0 = vmmov 0   ;;  %v757_v1 = vld [vmem:[%s231_s13] sm:$0xff]   ;;  %v758_v2 = vld [vmem:[%s231_s13 + $0x8] sm:$0xff]   ;;  %vm298_vm1 = vcmask 130048   ;;  %vm416_vm2 = vcmask 261120  }
  0x7e   : > { %906 = vsyncadd (%p1261_p13), [#allocation8], 4294967040  ;;  %669 = vmatprep.subr.bf16.mxu0 %v932_v0  ;;  %675 = vmatprep.subr.bf16.mxu1 %v932_v0  ;;  %v759_v3 = vld [vmem:[%s240_s27] sm:$0xff]   ;;  %v760_v4 = vld [vmem:[%s240_s27 + $0x8] sm:$0xff]   ;;  %s278_s25 = sld [smem:[#allocation3]]  ;;  %s637_s17 = sshll.u32 %s1156_s28, 5 }
  0x7f   : > { %671 = vmatprep.mubr.msk.bf16.mxu0 %vm933_vm0, %v932_v0  ;;  %677 = vmatprep.mubr.msk.bf16.mxu1 %vm933_vm0, %v932_v0  ;;  %v761_v5 = vld [vmem:[#allocation9] sm:$0xff]   ;;  %v762_v6 = vld [vmem:[#allocation9 + $0x8] sm:$0xff]   ;;  %s273_s7 = scalar_lea.vmem [#allocation10], %s637_s17  ;;  %vm496_vm4 = vcmask 523264   ;;  %s660_s10 = sshll.u32 %s991_s0, 9 }
  0x80   : > { %670 = vmatpush3.bf16.msra.mxu0 %v757_v1  ;;  %676 = vmatpush3.bf16.msra.mxu1 %v758_v2  ;;  %v648_v17 = vld [vmem:[%s1235_s4] ss:$0 sm:$0xff]  ;;  %s516_s30 = sshll.u32 %s273_s7, 4  ;;  %s1184_s0 = scalar_lea.hbm %s1236_s5, %s660_s10  ;;  %s1178_s30 = int_to_ptr.vmem [resolvable:$true] %s516_s30 }
  0x81   : > { %681 = vmatprep.subr.bf16.mxu0 %v761_v5  ;;  %s502_s11 = scalar_lea.sflag [#allocation6], %s1156_s28  ;;  %s851_s29 = scalar_lea.vmem %s1178_s30, 512 }
  0x82   : > { %p852_p3 = scmp.ne.s32.totalorder %s1178_s30, %s851_s29  ;;  %s934_s8 = smov [#allocation10]  }
  0x83   : > { %672 = vmatmul.mubr.msk.bf16.vlgmr.msra.gmra.mrb[0].mxu0 %vm298_vm1, %v759_v3  ;;  %678 = vmatmul.mubr.msk.bf16.vlgmr.msra.gmra.mrb[0].mxu1 %vm298_vm1, %v760_v4  ;;  %s855_s1 = sshll.u32 %s934_s8, 4  ;;  %s856_s1 = int_to_ptr.vmem [resolvable:$false] %s855_s1 }
  0x84   : > { %682 = vmatpush3.bf16.msra.mxu0 %v761_v5  ;;  %v487_v19 = vstv %s278_s25  ;;  %p853_p7 = pnand %p852_p3, %p1064_p12  ;;  %s857_s24 = scalar_lea.vmem %s856_s1, 1024 }
  0x85   : > { %683 = vmatprep.subr.bf16.mxu0 %v762_v6  ;;  %p858_p1 = scmp.lt.s32.totalorder %s1178_s30, %s856_s1  ;;  %p859_p5 = scmp.lt.s32.totalorder %s857_s24, %s851_s29 }
  0x86   : > { %p854_p9 = pneg %p853_p7 }
  0x87   : > { %p860_p2 = por %p859_p5, %p858_p1 }
  0x88   : > { %684 = vmatpush3.bf16.msra.mxu0 %v762_v6 }
  0x89   : > { %p861_p6 = pnand %p860_p2, %p854_p9 }
 0x156   : > { %v336_v7 = vpop.f32.mrb[0].mxu0  ;;  %v391_v8 = vpop.f32.mrb[0].mxu1 }
 0x157   : > { %v673_v9 = vpop.f32.mrb[1].mxu0  ;;  %v679_v10 = vpop.f32.mrb[1].mxu1 }
 0x158   : > { %v339_v11 = vpop.f32.mrb[2].mxu0  ;;  %v394_v13 = vpop.f32.mrb[2].mxu1 }
 0x159   : > { %v398_v12 = vpack.c.bf16 %v339_v11, %v336_v7  ;;  %v674_v14 = vpop.f32.mrb[3].mxu0  ;;  %v399_v15 = vpack.c.bf16 %v394_v13, %v391_v8  ;;  %v680_v16 = vpop.f32.mrb[3].mxu1 }
 0x15b   : > { %685 = vmatprep.mubr.msk.bf16.mxu0 %vm416_vm2, %v398_v12 }
 0x15c   : > { %686 = vmatmul.mubr.msk.bf16.vlgmr.msra.gmra.mrb[4].mxu0 %vm416_vm2, %v399_v15 }
 0x22f   : > { %v687_v18 = vpop.f32.mrb[4].mxu0 }
 0x230   : > { %v481_v20 = vadd.f32 %v687_v18, %v648_v17  ;;  %v457_v21 = vpop.f32.mrb[5].mxu0 }
 0x231   : > { %v479_v22 = vadd.f32 %v648_v17, %v457_v21  ;;  %v688_v23 = vpop.f32.mrb[6].mxu0 }
 0x232   : > { %vm485_vm3 = vcmp.ge.f32.partialorder %v481_v20, 0.0  ;;  %v490_v24 = vmul.f32 %v487_v19, %v481_v20  ;;  %v482_v25 = vadd.f32 %v688_v23, %v648_v17  ;;  %v460_v26 = vpop.f32.mrb[7].mxu0 }
 0x233   : > { %vm483_vm5 = vcmp.ge.f32.partialorder %v479_v22, 0.0  ;;  %v488_v27 = vmul.f32 %v487_v19, %v479_v22  ;;  %v480_v28 = vadd.f32 %v648_v17, %v460_v26 }
 0x234   : > { %v494_v29 = vsel %vm485_vm3, %v481_v20, %v490_v24  ;;  %vm486_vm6 = vcmp.ge.f32.partialorder %v482_v25, 0.0  ;;  %v491_v30 = vmul.f32 %v487_v19, %v482_v25 }
 0x235   : > { %499 = vst.msk [vmem:[%s273_s7 + $0x10] sm:$0xff] %vm496_vm4, %v494_v29  ;;  %v492_v31 = vsel %vm483_vm5, %v479_v22, %v488_v27  ;;  %vm484_vm7 = vcmp.ge.f32.partialorder %v480_v28, 0.0  ;;  %v489_v32 = vmul.f32 %v487_v19, %v480_v28 }
 0x236   : > { %497 = vst.msk [vmem:[%s273_s7] sm:$0xff] %vm496_vm4, %v492_v31  ;;  %v495_v33 = vsel %vm486_vm6, %v482_v25, %v491_v30 }
 0x237   : > { %500 = vst.msk [vmem:[%s273_s7 + $0x18] sm:$0xff] %vm496_vm4, %v495_v33  ;;  %v493_v34 = vsel %vm484_vm7, %v480_v28, %v489_v32 }
 0x238   : > { %498 = vst.msk [vmem:[%s273_s7 + $0x8] sm:$0xff] %vm496_vm4, %v493_v34 }
 0x239   : > { %864 = shalt.err (!%p861_p6)
}
 0x23a   : > { %s865_s16 = scalar_lea.hbm %s1184_s0, 512  ;;  %s869_s19 = scalar_lea.hbm %s1236_s5, 1024 }
 0x23b   : > { %p866_p8 = scmp.ne.s32.totalorder %s1184_s0, %s865_s16  ;;  %p870_p4 = scmp.lt.u32.totalorder %s1184_s0, %s1236_s5 }
 0x23c   : > { %p871_p11 = scmp.lt.u32.totalorder %s869_s19, %s865_s16  ;;  %p873_p3 = scmp.lt.u32.totalorder %s865_s16, %s1184_s0 }
 0x23d   : > { %p867_p10 = pnand %p866_p8, %p1064_p12 }
 0x23e   : > { %p872_p13 = por %p871_p11, %p870_p4 }
 0x23f   : > { %p868_p0 = pneg %p867_p10 }
 0x240   : > { %p874_p7 = por %p873_p3, %p872_p13 }
 0x242   : > { %p875_p9 = pnand %p874_p7, %p868_p0 }
 0x244   : > { %878 = shalt.err (!%p875_p9)
}
 0x245   : > { %s935_s17 = smov 128   ;;  %s936_s18 = smov 8  }
 0x246   : > { %697 = dma.vmem_to_hbm [thread:$0]  (%p1064_p12), %s1178_s30, 512, %s1184_s0, %s502_s11, %s935_s17, %s935_s17, %s936_s18  }
 0x247 PF: > { %s531_s12 = sand.u32 1, %s913_s20   ;;  %p1262_p1 = scmp.ne.s32.totalorder %s1247_s26, 0 }
 0x248   : > { %p1263_p5 = scmp.ge.s32.totalorder %s925_s23, 2  ;;  %s532_s7 = scalar_lea.sflag [#allocation6], %s531_s12 }
 0x24a   : > { %p711_p2 = pnand %p1263_p5, %p1262_p1 }
 0x24c   : > { %908 = dma.done.wait (!%p711_p2), %s532_s7, 512  }
 0x24d   : > { %910 = vsyncadd (!%p711_p2), %s532_s7, 4294966784  ;;  %s1264_s10 = sld [smem:[#allocation15_spill]]  ;;  %p22_p6 = scmp.ge.s32.totalorder %s1026_s6, 4  }
 0x24e   : > { %s1265_s20 = smov %s917_s21  ;;  %s1266_s21 = smov %s921_s22 }
 0x24f   : > { %s1268_s23 = smov %s1026_s6  ;;  %24 = sbr.rel (!%p22_p6) target bundleno = 11 (0xb), region = 98 }
 0x253   : > { %s1267_s22 = smov %s1264_s10 }
 0x256   :  { %537 = vsyncpa [#allocation5], 1 }
 0x257   :  { %539 = vsyncpa [#allocation5 + $0x1], 1 }
 0x258   :  { %540 = vsyncpa [#allocation8], 1 }
 0x259   :  { %542 = vsyncpa [#allocation8 + $0x1], 1 }
 0x25a   :  { %543 = vsyncpa [#allocation6], 1 }
 0x25b   :  { %545 = vsyncpa [#allocation6 + $0x1], 1 }

</bundles_post_ra>
